<compile_context>
chip_gen: v7x
topology: tpu7x:2x2x1
jax: 0.10.0
libtpu: 0.0.40
codegen_flags: <defaults>
</compile_context>

<pallas_src>
import jax
import jax.numpy as jnp
from jax.experimental import pallas as pl
from jax.experimental.pallas import tpu as pltpu

_LANE = 128                    # lane granularity
_MAX_TILE_BYTES = 2 << 20      # per VMEM buffer; x4 (in+out, double-buffered) = 8 MiB


def _round_up(x, m):
    return ((x + m - 1) // m) * m


# ----------------------------- Pallas kernel ------------------------------

def _tanh_scale_kernel(scale_ref, x_ref, o_ref):
    # scale_ref: (1,) f32 in SMEM; x_ref/o_ref: (tn, tc) tiles in VMEM.
    scale = scale_ref[0]
    x = x_ref[...].astype(jnp.float32)
    o_ref[...] = (jnp.tanh(x) * scale).astype(o_ref.dtype)


# ----------------------------- tile selection ------------------------------

def _pick_tiles(n_rows, s_cols, itemsize):
    sub = 8 * (4 // itemsize)          # sublane packing: 8 (f32) / 16 (bf16) / 32 (i8)

    # Lane tile over the s-column region (multiple of 128).
    tc = _round_up(s_cols, _LANE)

    # Sublane tile: multiple of `sub`, or the full row count (full-dim exemption).
    if n_rows % sub == 0:
        tn = min(n_rows, 1024)
    elif n_rows <= 1024:
        tn = n_rows
    else:
        tn = 1024                      # ragged last row block; Pallas masks edge writes

    # Keep each VMEM buffer under the byte budget: shrink columns first, then rows.
    while tn * tc * itemsize > _MAX_TILE_BYTES and tc > _LANE:
        tc = _round_up((tc + 1) // 2, _LANE)
    while tn * tc * itemsize > _MAX_TILE_BYTES and tn % sub == 0 and tn > sub:
        tn = _round_up((tn + 1) // 2, sub)

    # v7x: guarantee >= 2 grid steps so the "parallel" axes span both TensorCores.
    if pl.cdiv(n_rows, tn) * pl.cdiv(s_cols, tc) < 2:
        if tc >= 2 * _LANE:
            tc = _round_up((tc + 1) // 2, _LANE)
        elif tn % (2 * sub) == 0:
            tn //= 2
    return tn, tc


# --------------------------- tanh(s)*scale on s-half ------------------------

def _tanh_scale_s_half(x2d, s_cols, scale):
    """tanh(x2d[:, :s_cols]) * scale, tiled directly over the flat x."""
    n_rows, _ = x2d.shape
    dtype = x2d.dtype
    itemsize = jnp.dtype(dtype).itemsize

    tn, tc = _pick_tiles(n_rows, s_cols, itemsize)
    grid = (pl.cdiv(n_rows, tn), pl.cdiv(s_cols, tc))

    return pl.pallas_call(
        _tanh_scale_kernel,
        out_shape=jax.ShapeDtypeStruct((n_rows, s_cols), dtype),
        grid=grid,
        in_specs=[
            pl.BlockSpec(memory_space=pltpu.MemorySpace.SMEM),   # scale (1,)
            pl.BlockSpec((tn, tc), lambda i, j: (i, j)),         # s columns of x2d
        ],
        out_specs=pl.BlockSpec((tn, tc), lambda i, j: (i, j)),
        compiler_params=pltpu.CompilerParams(
            dimension_semantics=("parallel", "parallel"),
        ),
    )(scale.reshape(1).astype(jnp.float32), x2d)


# ------------------------------ forward pass ------------------------------

def split_and_norm_forward(x, scale, *, min_pallas_elems=64 * 1024):
    """x: (N, C, H, W); returns (tanh(x[:, :k]) * scale, x[:, k:])."""
    n, c = x.shape[0], x.shape[1]
    k = c // 2
    spatial = 1
    for d in x.shape[2:]:
        spatial *= d
    s_cols = k * spatial

    # Pass-through half: left to XLA on purpose (it is a returned slice the
    # compiler materializes once; fusing it into the kernel is a minor win).
    t = x[:, k:]

    # Small-size fallback: fixed pallas_call overhead would dominate.
    if n * s_cols < min_pallas_elems or s_cols < _LANE or k == 0 or n == 0:
        return jnp.tanh(x[:, :k]) * scale[0], t

    x2d = x.reshape(n, c * spatial)                 # contiguous -> free reshape
    s2d = _tanh_scale_s_half(x2d, s_cols, scale)    # (n, k*spatial)
    return s2d.reshape((n, k) + x.shape[2:]), t


# ---------------------------------- main -----------------------------------

if __name__ == "__main__":
    key = jax.random.PRNGKey(0)
    N, C, H, W = 2, 4, 16, 16
    x = jax.random.normal(key, (N, C, H, W), jnp.float32)
    k = C // 2

    # Force the Pallas path at this small demo size (fallback would skip it).
    fwd = jax.jit(lambda xx, ss: split_and_norm_forward(xx, ss, min_pallas_elems=0))

    for sval in (1.0, 0.75):            # 1.0 = module init; 0.75 checks the multiply
        scale = jnp.array([sval], jnp.float32)
        s_out, t_out = fwd(x, scale)
        jax.block_until_ready((s_out, t_out))

        ref_s = jnp.tanh(x[:, :k]) * scale[0]
        ref_t = x[:, k:]
        assert s_out.shape == ref_s.shape == (N, k, H, W)
        assert t_out.shape == ref_t.shape == (N, C - k, H, W)
        assert jnp.allclose(s_out, ref_s, atol=1e-5, rtol=1e-5), (
            f"max abs err {jnp.max(jnp.abs(s_out - ref_s))}")
        assert jnp.allclose(t_out, ref_t), "pass-through half mismatch"

    print("KERNEL_OK")
</pallas_src>

<mosaic_0001>
module attributes {stable_mosaic.version = 11 : i64} {
  func.func @_tanh_scale_kernel(%arg0: i32, %arg1: i32, %arg2: memref<1xf32, #tpu.memory_space<smem>>, %arg3: memref<2x256xf32, #tpu.memory_space<vmem>>, %arg4: memref<2x256xf32, #tpu.memory_space<vmem>>) attributes {dimension_semantics = [#tpu.dimension_semantics<parallel>, #tpu.dimension_semantics<parallel>], iteration_bounds = array<i64: 1, 2>, scalar_prefetch = 0 : i64, scratch_operands = 0 : i64, tpu.core_type = #tpu.core_type<tc>, window_params = [{transform_indices = @transform_0, window_bounds = array<i64: 1>}, {transform_indices = @transform_1, window_bounds = array<i64: 2, 256>}, {transform_indices = @transform_2, window_bounds = array<i64: 2, 256>}]} {
    %c0 = arith.constant 0 : index
    %0 = memref.load %arg2[%c0] : memref<1xf32, #tpu.memory_space<smem>>
    %c0_0 = arith.constant 0 : index
    %c0_1 = arith.constant 0 : index
    %1 = vector.load %arg3[%c0_0, %c0_1] : memref<2x256xf32, #tpu.memory_space<vmem>>, vector<2x256xf32>
    %2 = math.tanh %1 : vector<2x256xf32>
    %3 = vector.broadcast %0 : f32 to vector<2x256xf32>
    %4 = arith.mulf %2, %3 : vector<2x256xf32>
    %c0_2 = arith.constant 0 : index
    %c0_3 = arith.constant 0 : index
    %5 = vector.load %arg4[%c0_2, %c0_3] : memref<2x256xf32, #tpu.memory_space<vmem>>, vector<2x256xf32>
    tpu.vector_store %arg4[%c0_2, %c0_3], %4 {strides = array<i32>} : memref<2x256xf32, #tpu.memory_space<vmem>>, vector<2x256xf32>,
    return
  }
  func.func @transform_0(%arg0: i32, %arg1: i32) -> i32 {
    %c0_i32 = arith.constant 0 : i32
    %c0_i32_0 = arith.constant 0 : i32
    return %c0_i32 : i32
  }
  func.func @transform_1(%arg0: i32, %arg1: i32) -> (i32, i32) {
    %c0_i32 = arith.constant 0 : i32
    return %arg0, %arg1 : i32, i32
  }
  func.func @transform_2(%arg0: i32, %arg1: i32) -> (i32, i32) {
    %c0_i32 = arith.constant 0 : i32
    return %arg0, %arg1 : i32, i32
  }
}

</mosaic_0001>

<bundles_post_ra>
// kernel: _lambda_.1
= control target key start
LH: loop header
LB: loop body
LE: loop exit
PB: predicated region body
PF: predicated region fallthrough
CT: control target
= control target key end

     0   :  { %s356_s11 = smov 0   ;;  %s358_s12 = smov 0   ;;  %s382_s0 = inlined_call_operand.<no memory space> [shape: f32[1], index: 0, kind: input, shape index: {}]   ;;  %s383_s1 = inlined_call_operand.vmem [shape: f32[2,1024], index: 1, kind: input, shape index: {}]   ;;  %s384_s2 = inlined_call_operand.vmem [shape: f32[2,512], index: 2, kind: output, shape index: {}]  }
   0x1   :  { %7 = sst [smem:[#allocation2]] %s382_s0  ;;  %s360_s13 = smov 0  }
   0x2 LB: > { %s22_s14 = sadd.s32 1, %s332_s12  ;;  %p281_p0 = scmp.ge.s32.totalorder %s336_s13, 1  ;;  %s336_s13 = sphi %s360_s13, %s13_s13   ;;  %s332_s12 = sphi %s358_s12, %s386_s12   ;;  %s328_s11 = sphi %s356_s11, %s385_s11  }
   0x3   : > { %p23_p1 = scmp.ge.s32.totalorder %s22_s14, 2  ;;  %p134_p2 = scmp.lt.s32.totalorder %s336_s13, 3 }
   0x5   : > { %s388_s14 = smov (%p23_p1, %s22_s14), 0  ;;  %p135_p3 = pnand %p281_p0, %p134_p2 }
   0x6   : > { %s282_s0 = sshll.u32 (!%p135_p3), %s328_s11, 1  ;;  %s184_s20 = sld [smem:[#allocation2]] (!%p135_p3) }
   0x7   : > { %138 = sbr.rel (%p135_p3) target bundleno = 33 (0x21), region = 28  ;;  %p167_p4 = scmp.lt.s32.totalorder (!%p135_p3), %s282_s0, 7 }
   0x8   : > { %p177_p5 = scmp.lt.s32.totalorder (!%p135_p3), %s282_s0, 3 }
   0xc   : > { %v187_v1 = vstv (!%p135_p3), %s184_s20 }
   0xe   : > { %s168_s15 = scalar_select %p167_p4, %s282_s0, 7 }
   0xf   : > { %s390_s0 = smov (!%p177_p5, %s282_s0), 3 }
  0x10   : > { %s283_s16 = sshll.u32 %s168_s15, 1  ;;  %s285_s21 = sshll.u32 %s390_s0, 1 }
  0x11   : > { %s172_s19 = scalar_lea.vmem %s383_s1, %s283_s16  ;;  %s182_s24 = scalar_lea.vmem %s384_s2, %s285_s21 }
  0x12   : > { %v185_v0 = vld [vmem:[%s172_s19] sm:$0xf] }
  0x13   : > { %312 = vtanh.f32 %v185_v0 }
  0x1d   : > { %v313_v2 = vpop.eup %312 }
  0x1e   : > { %v188_v3 = vmul.f32 %v313_v2, %v187_v1 }
  0x20   : > { %189 = vst [vmem:[%s182_s24] sm:$0xf] %v188_v3 }
  0x21 PF: > { %s13_s13 = sadd.s32 1, %s336_s13   ;;  %s385_s11 = smov %s332_s12 }
  0x22   : > { %p10_p6 = scmp.ge.s32.totalorder %s13_s13, 4   ;;  %s386_s12 = smov %s388_s14 }
  0x24   :  { %12 = sbr.rel (!%p10_p6) target bundleno = 2 (0x2), region = 58 }

</bundles_post_ra>
